<compile_context>
chip_gen: v7x
topology: tpu7x:2x2x1
jax: 0.10.0
libtpu: 0.0.40
codegen_flags: <defaults>
</compile_context>

<pallas_src>
import numpy as np
import jax
import jax.numpy as jnp
from jax.experimental import pallas as pl
from jax.experimental.pallas import tpu as pltpu


def _round_up(a: int, b: int) -> int:
    return -(-a // b) * b


def _cdiv(a: int, b: int) -> int:
    return -(-a // b)


# ----------------------------- host-side constant matrices -------------------
def _avg_pool_matrix(size: int, scale: int) -> np.ndarray:
    """(size//scale, size) matrix implementing 1-D average pooling."""
    out = size // scale
    m = np.zeros((out, size), dtype=np.float32)
    for i in range(out):
        m[i, i * scale:(i + 1) * scale] = 1.0 / scale
    return m


def _bilinear_up_matrix(in_size: int, scale: int) -> np.ndarray:
    """(in_size*scale, in_size) matrix implementing 1-D bilinear upsampling
    with PyTorch align_corners=False semantics."""
    out_size = in_size * scale
    m = np.zeros((out_size, in_size), dtype=np.float32)
    for i in range(out_size):
        src = (i + 0.5) / scale - 0.5
        src = max(src, 0.0)
        i0 = min(int(np.floor(src)), in_size - 1)
        i1 = min(i0 + 1, in_size - 1)
        l1 = src - i0
        m[i, i0] += 1.0 - l1
        m[i, i1] += l1
    return m


def _vmem_cap_bytes() -> int:
    """~0.7x of per-core VMEM capacity (generation-aware), with a safe default
    that also fits v7x's 64 MiB/TC."""
    try:
        return int(pltpu.get_tpu_info().vmem_capacity_bytes * 0.7)
    except Exception:
        return 40 << 20


# --------------------------------- Pallas kernels -----------------------------
def _kron_lowrank_kernel(x_ref, e_ref, d_ref, o_ref):
    # Fused low-rank operator: (TR, H*W) @ (H*W, Lp) @ (Lp, H*W).
    # The (TR, Lp) intermediate stays in VMEM / vregs, never goes to HBM.
    tmp = jnp.dot(x_ref[...], e_ref[...], preferred_element_type=jnp.float32)
    o_ref[...] = jnp.dot(tmp, d_ref[...], preferred_element_type=jnp.float32)


def _separable_kernel(x_ref, a_ref, b_ref, o_ref):
    # Fallback for very large spatial sizes: out = A @ x @ B per image,
    # with the (H, W) intermediate held in VMEM (no HBM round trip).
    x = x_ref[0]
    tmp = jnp.dot(a_ref[...], x, preferred_element_type=jnp.float32)
    o_ref[0] = jnp.dot(tmp, b_ref[...], preferred_element_type=jnp.float32)


# --------------------------------- tiling helpers -----------------------------
def _choose_row_tile(num_rows: int, hw: int) -> int:
    """Row tile (multiple of 8). Small M -> a single full-size grid step;
    large M -> ~512-row tiles, capped so double-buffered in+out tiles stay
    under ~12 MiB."""
    cap = max(8, ((12 << 20) // (hw * 16)) // 8 * 8)
    if num_rows <= 256:
        return min(_round_up(num_rows, 8), max(cap, 8))
    steps = _cdiv(num_rows, 512)
    return max(8, min(_round_up(_cdiv(num_rows, steps), 8), cap))


def _kron_lowrank_apply(x2d: jax.Array, e: jax.Array, d: jax.Array) -> jax.Array:
    """out = x2d @ E @ D with one fused, row-tiled Pallas kernel."""
    m, hw = x2d.shape
    lp = e.shape[1]
    tr = _choose_row_tile(m, hw)
    m_pad = _round_up(m, tr)
    if m_pad != m:
        x2d = jnp.pad(x2d, ((0, m_pad - m), (0, 0)))
    grid = (m_pad // tr,)

    # weights (double-buffered by default) + double-buffered in/out tiles + headroom
    needed = (4 * hw * lp + 4 * tr * hw) * 4 + (8 << 20)
    vmem_limit = int(min(max(needed, 32 << 20), _vmem_cap_bytes()))

    out = pl.pallas_call(
        _kron_lowrank_kernel,
        out_shape=jax.ShapeDtypeStruct((m_pad, hw), jnp.float32),
        grid_spec=pltpu.PrefetchScalarGridSpec(
            num_scalar_prefetch=0,
            grid=grid,
            in_specs=[
                pl.BlockSpec((tr, hw), lambda r: (r, 0)),
                pl.BlockSpec((hw, lp), lambda r: (0, 0)),   # resident pooling factor
                pl.BlockSpec((lp, hw), lambda r: (0, 0)),   # resident upsample factor
            ],
            out_specs=pl.BlockSpec((tr, hw), lambda r: (r, 0))),
        compiler_params=pltpu.CompilerParams(
            dimension_semantics=("parallel",) if grid[0] > 1 else ("arbitrary",),
            vmem_limit_bytes=vmem_limit),
    )(x2d.astype(jnp.float32), e, d)
    return out[:m]


def _separable_apply(x3d: jax.Array, a: jax.Array, b: jax.Array) -> jax.Array:
    """out[i] = A @ x3d[i] @ B, one grid step per image."""
    m, h, w = x3d.shape
    needed = (4 * h * w + 2 * h * h + 2 * w * w) * 4 + (8 << 20)
    vmem_limit = int(min(max(needed, 32 << 20), _vmem_cap_bytes()))
    # TODO(synk): output lane dim is W here (may be <128-dense); acceptable for
    # the large-spatial fallback path only.
    return pl.pallas_call(
        _separable_kernel,
        out_shape=jax.ShapeDtypeStruct((m, h, w), jnp.float32),
        grid_spec=pltpu.PrefetchScalarGridSpec(
            num_scalar_prefetch=0,
            grid=(m,),
            in_specs=[
                pl.BlockSpec((1, h, w), lambda i: (i, 0, 0)),
                pl.BlockSpec((h, h), lambda i: (0, 0)),
                pl.BlockSpec((w, w), lambda i: (0, 0)),
            ],
            out_specs=pl.BlockSpec((1, h, w), lambda i: (i, 0, 0))),
        compiler_params=pltpu.CompilerParams(
            dimension_semantics=("parallel",),
            vmem_limit_bytes=vmem_limit),
    )(x3d.astype(jnp.float32), a.astype(jnp.float32), b.astype(jnp.float32))


# --------------------------------- encoder+decoder ---------------------------
def ae_fixed_apply(x_flat: jax.Array, scale: int) -> jax.Array:
    """x_flat: (M, H, W) float32 -> reconstructed (M, H, W) float32."""
    m, h, w = x_flat.shape
    assert h % scale == 0 and w % scale == 0
    hp, wp = h // scale, w // scale

    ph = _avg_pool_matrix(h, scale)          # (hp, h)   pool along H
    pw = _avg_pool_matrix(w, scale)          # (wp, w)   pool along W
    uh = _bilinear_up_matrix(hp, scale)      # (h, hp)   upsample along H
    uw = _bilinear_up_matrix(wp, scale)      # (w, wp)   upsample along W

    hw = h * w
    latent = hp * wp
    lp = _round_up(latent, 128)              # lane-dense intermediate width
    factored_weight_bytes = 2 * hw * lp * 4

    if factored_weight_bytes <= (8 << 20):
        # Low-rank Kronecker factorization of the full operator:
        #   out_row = x_row @ kron(ph^T, pw^T) @ kron(uh^T, uw^T) = x_row @ E @ D
        e = np.zeros((hw, lp), dtype=np.float32)
        e[:, :latent] = np.kron(ph.T, pw.T)          # (H*W, Hp*Wp), zero-padded
        d = np.zeros((lp, hw), dtype=np.float32)
        d[:latent, :] = np.kron(uh.T, uw.T)          # (Hp*Wp, H*W), zero-padded
        out2d = _kron_lowrank_apply(x_flat.reshape(m, hw),
                                    jnp.asarray(e), jnp.asarray(d))
        return out2d.reshape(m, h, w)

    # Fused separable fallback for very large spatial sizes.
    a = jnp.asarray(uh @ ph, dtype=jnp.float32)      # (h, h)
    b = jnp.asarray(pw.T @ uw.T, dtype=jnp.float32)  # (w, w)
    return _separable_apply(x_flat, a, b)


# --------------------------------- AE_fixed forward --------------------------
def ae_fixed_forward(observations: jax.Array, key: jax.Array, scale: int = 16):
    """observations: (b, n, c, h, w) float32.  Returns (input_snapshots,
    reconstructed_snapshots), both (b, 3, c, h, w)."""
    b, n, c, h, w = observations.shape
    assert n > 2
    k1, k2 = jax.random.split(key)
    # target index ~ U{2, ..., n-1};  reference = target - 1;
    # conditioning ~ U{0, ..., target-2}  (torch.randint(0, s-1)).
    target_idx = jax.random.randint(k1, (b,), 2, n)
    ref_idx = target_idx - 1
    u = jax.random.uniform(k2, (b,))
    cond_idx = jnp.floor(u * (target_idx - 1).astype(jnp.float32)).astype(jnp.int32)

    bidx = jnp.arange(b)
    target = observations[bidx, target_idx]
    refer = observations[bidx, ref_idx]
    cond = observations[bidx, cond_idx]
    input_snapshots = jnp.stack([target, refer, cond], axis=1)       # (b, 3, c, h, w)

    flat = input_snapshots.reshape(b * 3 * c, h, w)
    recon_flat = ae_fixed_apply(flat, scale)
    reconstructed = recon_flat.reshape(b, 3, c, h, w)
    return input_snapshots, reconstructed


# --------------------------------- reference (numpy) -------------------------
def _ref_numpy(x_flat: np.ndarray, scale: int) -> np.ndarray:
    x = np.asarray(x_flat)
    m, h, w = x.shape
    hp, wp = h // scale, w // scale
    pooled = x.reshape(m, hp, scale, wp, scale).mean(axis=(2, 4))
    out = np.zeros((m, h, w), dtype=np.float32)
    for i in range(h):
        si = max((i + 0.5) / scale - 0.5, 0.0)
        i0 = min(int(np.floor(si)), hp - 1)
        i1 = min(i0 + 1, hp - 1)
        li = si - i0
        for j in range(w):
            sj = max((j + 0.5) / scale - 0.5, 0.0)
            j0 = min(int(np.floor(sj)), wp - 1)
            j1 = min(j0 + 1, wp - 1)
            lj = sj - j0
            out[:, i, j] = ((1 - li) * (1 - lj) * pooled[:, i0, j0]
                            + (1 - li) * lj * pooled[:, i0, j1]
                            + li * (1 - lj) * pooled[:, i1, j0]
                            + li * lj * pooled[:, i1, j1])
    return out


if __name__ == "__main__":
    key = jax.random.PRNGKey(0)
    k_obs, k_fwd = jax.random.split(key)

    # Small shapes consistent with the module: b=2, num_observations=4,
    # channels=4, spatial=32, scale=16 (pooled latent is 2x2).
    b, n, c, h, w, scale = 2, 4, 4, 32, 32, 16
    observations = jax.random.normal(k_obs, (b, n, c, h, w), dtype=jnp.float32)

    input_snapshots, reconstructed = ae_fixed_forward(observations, k_fwd, scale=scale)
    jax.block_until_ready((input_snapshots, reconstructed))

    assert input_snapshots.shape == (b, 3, c, h, w)
    assert reconstructed.shape == (b, 3, c, h, w)

    # Independent numpy reference for the encoder+decoder hot path.
    ref = _ref_numpy(np.asarray(input_snapshots).reshape(b * 3 * c, h, w), scale)
    np.testing.assert_allclose(
        np.asarray(reconstructed).reshape(b * 3 * c, h, w), ref, rtol=1e-3, atol=1e-3)

    print("KERNEL_OK")
</pallas_src>

<mosaic_0001>
module attributes {stable_mosaic.version = 11 : i64} {
  func.func @_kron_lowrank_kernel(%arg0: i32, %arg1: memref<24x1024xf32, #tpu.memory_space<vmem>>, %arg2: memref<1024x128xf32, #tpu.memory_space<vmem>>, %arg3: memref<128x1024xf32, #tpu.memory_space<vmem>>, %arg4: memref<24x1024xf32, #tpu.memory_space<vmem>>) attributes {dimension_semantics = [#tpu.dimension_semantics<arbitrary>], iteration_bounds = array<i64: 1>, scalar_prefetch = 0 : i64, scratch_operands = 0 : i64, tpu.core_type = #tpu.core_type<tc>, window_params = [{transform_indices = @transform_0, window_bounds = array<i64: 24, 1024>}, {pipeline_mode = #tpu.pipeline_mode<synchronous>, transform_indices = @transform_1, window_bounds = array<i64: 1024, 128>}, {pipeline_mode = #tpu.pipeline_mode<synchronous>, transform_indices = @transform_2, window_bounds = array<i64: 128, 1024>}, {transform_indices = @transform_3, window_bounds = array<i64: 24, 1024>}]} {
    %c0 = arith.constant 0 : index
    %c0_0 = arith.constant 0 : index
    %0 = vector.load %arg1[%c0, %c0_0] : memref<24x1024xf32, #tpu.memory_space<vmem>>, vector<24x1024xf32>
    %c0_1 = arith.constant 0 : index
    %c0_2 = arith.constant 0 : index
    %1 = vector.load %arg2[%c0_1, %c0_2] : memref<1024x128xf32, #tpu.memory_space<vmem>>, vector<1024x128xf32>
    %cst = arith.constant dense<0.000000e+00> : vector<24x128xf32>
    %2 = tpu.matmul %0, %1, %cst {dimension_numbers = #tpu.dot_dimension_numbers<[1], [0], [0], [1], [0, 0, 1, 1], [], []>} : vector<24x1024xf32>, vector<1024x128xf32>, vector<24x128xf32> -> vector<24x128xf32>
    %c0_3 = arith.constant 0 : index
    %c0_4 = arith.constant 0 : index
    %3 = vector.load %arg3[%c0_3, %c0_4] : memref<128x1024xf32, #tpu.memory_space<vmem>>, vector<128x1024xf32>
    %cst_5 = arith.constant dense<0.000000e+00> : vector<24x1024xf32>
    %4 = tpu.matmul %2, %3, %cst_5 {dimension_numbers = #tpu.dot_dimension_numbers<[1], [0], [0], [1], [0, 0, 1, 1], [], []>} : vector<24x128xf32>, vector<128x1024xf32>, vector<24x1024xf32> -> vector<24x1024xf32>
    %c0_6 = arith.constant 0 : index
    %c0_7 = arith.constant 0 : index
    %5 = vector.load %arg4[%c0_6, %c0_7] : memref<24x1024xf32, #tpu.memory_space<vmem>>, vector<24x1024xf32>
    tpu.vector_store %arg4[%c0_6, %c0_7], %4 {strides = array<i32>} : memref<24x1024xf32, #tpu.memory_space<vmem>>, vector<24x1024xf32>,
    return
  }
  func.func @transform_0(%arg0: i32) -> (i32, i32) {
    %c0_i32 = arith.constant 0 : i32
    %c0_i32_0 = arith.constant 0 : i32
    return %arg0, %c0_i32 : i32, i32
  }
  func.func @transform_1(%arg0: i32) -> (i32, i32) {
    %c0_i32 = arith.constant 0 : i32
    %c0_i32_0 = arith.constant 0 : i32
    %c0_i32_1 = arith.constant 0 : i32
    return %c0_i32, %c0_i32_0 : i32, i32
  }
  func.func @transform_2(%arg0: i32) -> (i32, i32) {
    %c0_i32 = arith.constant 0 : i32
    %c0_i32_0 = arith.constant 0 : i32
    %c0_i32_1 = arith.constant 0 : i32
    return %c0_i32, %c0_i32_0 : i32, i32
  }
  func.func @transform_3(%arg0: i32) -> (i32, i32) {
    %c0_i32 = arith.constant 0 : i32
    %c0_i32_0 = arith.constant 0 : i32
    return %arg0, %c0_i32 : i32, i32
  }
}

</mosaic_0001>

<bundles_post_ra>
// kernel: tpu_custom_call.1
= control target key start
LH: loop header
LB: loop body
LE: loop exit
PB: predicated region body
PF: predicated region fallthrough
CT: control target
= control target key end

     0   :  { %8 = vsyncpa [#allocation3], 0  ;;  %s1672_s0 = inlined_call_operand.hbm [shape: f32[24,1024], index: 0, kind: input, shape index: {}]   ;;  %s1673_s1 = inlined_call_operand.hbm [shape: f32[1024,128], index: 1, kind: input, shape index: {}]   ;;  %s1674_s2 = inlined_call_operand.hbm [shape: f32[128,1024], index: 2, kind: input, shape index: {}]   ;;  %s1675_s3 = inlined_call_operand.hbm [shape: f32[24,1024], index: 3, kind: output, shape index: {}]  }
   0x1   :  { %9 = vsyncpa [#allocation6], 0 }
   0x2   :  { %10 = vsyncpa [#allocation4], 0  ;;  %s1553_s12 = smov [#allocation5]   ;;  %s1459_s16 = scalar_lea.hbm %s1673_s1, 16384 }
   0x3   :  { %s28_s13 = sshll.u32 %s1553_s12, 4  ;;  %p1460_p0 = scmp.ne.s32.totalorder %s1673_s1, %s1459_s16  ;;  %s29_s13 = int_to_ptr.vmem [resolvable:$true] %s28_s13 }
   0x4   :  { %p1463_p1 = scmp.lt.u32.totalorder %s1459_s16, %s1673_s1 }
   0x6   :  { %p1465_p2 = pnand %p1463_p1, %p1460_p0 }
   0x8   :  { %1468 = shalt.err (!%p1465_p2)
}
   0x9   :  { %s1469_s21 = scalar_lea.vmem %s29_s13, 16384  ;;  %p1474_p4 = scmp.lt.s32.totalorder %s29_s13, %s29_s13 }
   0xa   :  { %p1470_p3 = scmp.ne.s32.totalorder %s29_s13, %s1469_s21  ;;  %p1475_p5 = scmp.lt.s32.totalorder %s1469_s21, %s1469_s21 }
   0xc   :  { %p1476_p6 = por %p1475_p5, %p1474_p4 }
   0xe   :  { %p1477_p7 = pnand %p1476_p6, %p1470_p3 }
  0x10   :  { %1480 = shalt.err (!%p1477_p7)
}
  0x11   :  { %s1554_s22 = smov 128   ;;  %s1555_s23 = smov 8  }
  0x12   :  { %34 = dma.hbm_to_vmem [thread:$0]  %s1673_s1, 16384, %s29_s13, [#allocation6], %s1554_s22, %s1554_s22, %s1555_s23  }
  0x13   :  { %s1556_s26 = smov [#allocation2]   ;;  %s1481_s30 = scalar_lea.hbm %s1672_s0, 3072 }
  0x14   :  { %s16_s27 = sshll.u32 %s1556_s26, 4  ;;  %p1482_p8 = scmp.ne.s32.totalorder %s1672_s0, %s1481_s30  ;;  %s17_s27 = int_to_ptr.vmem [resolvable:$true] %s16_s27 }
  0x15   :  { %p1485_p9 = scmp.lt.u32.totalorder %s1481_s30, %s1672_s0 }
  0x17   :  { %p1487_p10 = pnand %p1485_p9, %p1482_p8 }
  0x19   :  { %1490 = shalt.err (!%p1487_p10)
}
  0x1a   :  { %s1491_s8 = scalar_lea.vmem %s17_s27, 3072  ;;  %p1496_p12 = scmp.lt.s32.totalorder %s17_s27, %s17_s27 }
  0x1b   :  { %p1492_p11 = scmp.ne.s32.totalorder %s17_s27, %s1491_s8  ;;  %p1497_p13 = scmp.lt.s32.totalorder %s1491_s8, %s1491_s8 }
  0x1d   :  { %p1498_p0 = por %p1497_p13, %p1496_p12 }
  0x1f   :  { %p1499_p1 = pnand %p1498_p0, %p1492_p11 }
  0x21   :  { %1502 = shalt.err (!%p1499_p1)
}
  0x22   :  { %s1557_s1 = smov 1024   ;;  %s1558_s9 = smov 64  }
  0x23   :  { %22 = dma.hbm_to_vmem [thread:$0]  %s1672_s0, 3072, %s17_s27, [#allocation3], %s1557_s1, %s1557_s1, %s1558_s9  }
  0x24   :  { %s1559_s12 = smov [#allocation7]   ;;  %s1503_s16 = scalar_lea.hbm %s1674_s2, 16384 }
  0x25   :  { %s40_s13 = sshll.u32 %s1559_s12, 4  ;;  %p1504_p2 = scmp.ne.s32.totalorder %s1674_s2, %s1503_s16  ;;  %s41_s13 = int_to_ptr.vmem [resolvable:$true] %s40_s13 }
  0x26   :  { %p1507_p3 = scmp.lt.u32.totalorder %s1503_s16, %s1674_s2 }
  0x28   :  { %p1509_p4 = pnand %p1507_p3, %p1504_p2 }
  0x2a   :  { %1512 = shalt.err (!%p1509_p4)
}
  0x2b   :  { %s1513_s21 = scalar_lea.vmem %s41_s13, 16384  ;;  %p1518_p6 = scmp.lt.s32.totalorder %s41_s13, %s41_s13 }
  0x2c   :  { %p1514_p5 = scmp.ne.s32.totalorder %s41_s13, %s1513_s21  ;;  %p1519_p7 = scmp.lt.s32.totalorder %s1513_s21, %s1513_s21 }
  0x2e   :  { %p1520_p8 = por %p1519_p7, %p1518_p6 }
  0x30   :  { %p1521_p9 = pnand %p1520_p8, %p1514_p5 }
  0x32   :  { %1524 = shalt.err (!%p1521_p9)
}
  0x33   :  { %46 = dma.hbm_to_vmem [thread:$0]  %s1674_s2, 16384, %s41_s13, [#allocation6], %s1557_s1, %s1557_s1, %s1558_s9  }
  0x34   :  { %1547 = dma.done.wait [#allocation3], 3072  }
  0x35   :  { %1548 = vsyncadd [#allocation3], 4294964224 }
  0x36   :  { %1549 = dma.done.wait [#allocation6], 32768  }
  0x37   :  { %1550 = vsyncadd [#allocation6], 4294934528  ;;  %v96_v0 = vld [vmem:[#allocation5 + $0x80] sm:$0xff]  ;;  %v97_v1 = vld [vmem:[#allocation5 + $0x88] sm:$0xff]  ;;  %s1561_s2 = smov [#allocation8]  }
  0x38   :  { %v128_v2 = vld [vmem:[#allocation5 + $0x180] sm:$0xff]  ;;  %v1194_v3 = vpack.c.bf16 %v97_v1, %v96_v0  ;;  %v129_v4 = vld [vmem:[#allocation5 + $0x188] sm:$0xff]  ;;  %v98_v11 = vld [vmem:[#allocation5 + $0x90] sm:$0xff]  ;;  %s1017_s23 = sshll.u32 %s1561_s2, 4  ;;  %s1018_s23 = int_to_ptr.vmem [resolvable:$true] %s1017_s23 }
  0x39   :  { %v80_v5 = vld [vmem:[#allocation5] sm:$0xff]  ;;  %v81_v6 = vld [vmem:[#allocation5 + $0x8] sm:$0xff]  ;;  %v1226_v7 = vpack.c.bf16 %v129_v4, %v128_v2  ;;  %v99_v13 = vld [vmem:[#allocation5 + $0x98] sm:$0xff]  ;;  %s1525_s24 = scalar_lea.vmem %s1018_s23, 3072  ;;  %p1530_p11 = scmp.lt.s32.totalorder %s1018_s23, %s1018_s23 }
  0x3a   :  { %v1196_v8 = vpack.c.bf16 %v81_v6, %v80_v5  ;;  %v112_v9 = vld [vmem:[#allocation5 + $0x100] sm:$0xff]  ;;  %v113_v10 = vld [vmem:[#allocation5 + $0x108] sm:$0xff]  ;;  %1195 = vmatprep.subr.bf16.mxu0 %v1194_v3  ;;  %v130_v14 = vld [vmem:[#allocation5 + $0x190] sm:$0xff]  ;;  %v1198_v16 = vpack.c.bf16 %v99_v13, %v98_v11  ;;  %p1526_p10 = scmp.ne.s32.totalorder %s1018_s23, %s1525_s24  ;;  %p1531_p12 = scmp.lt.s32.totalorder %s1525_s24, %s1525_s24 }
  0x3b   :  { %v1228_v12 = vpack.c.bf16 %v113_v10, %v112_v9  ;;  %v131_v15 = vld [vmem:[#allocation5 + $0x198] sm:$0xff]  ;;  %1227 = vmatprep.subr.bf16.mxu1 %v1226_v7  ;;  %v82_v18 = vld [vmem:[#allocation5 + $0x10] sm:$0xff]  ;;  %v100_v23 = vld [vmem:[#allocation5 + $0xa0] sm:$0xff] }
  0x3c   :  { %1197 = vmatpush3.bf16.msra.mxu0 %v1196_v8  ;;  %v1230_v17 = vpack.c.bf16 %v131_v15, %v130_v14  ;;  %v83_v19 = vld [vmem:[#allocation5 + $0x18] sm:$0xff]  ;;  %v114_v20 = vld [vmem:[#allocation5 + $0x110] sm:$0xff]  ;;  %v101_v24 = vld [vmem:[#allocation5 + $0xa8] sm:$0xff]  ;;  %p1532_p13 = por %p1531_p12, %p1530_p11 }
  0x3d   :  { %1229 = vmatpush3.bf16.msra.mxu1 %v1228_v12  ;;  %v1200_v21 = vpack.c.bf16 %v83_v19, %v82_v18  ;;  %v115_v22 = vld [vmem:[#allocation5 + $0x118] sm:$0xff]  ;;  %1199 = vmatprep.subr.bf16.mxu0 %v1198_v16  ;;  %v1202_v26 = vpack.c.bf16 %v101_v24, %v100_v23  ;;  %v132_v27 = vld [vmem:[#allocation5 + $0x1a0] sm:$0xff]  ;;  %v133_v28 = vld [vmem:[#allocation5 + $0x1a8] sm:$0xff] }
  0x3e   :  { %1231 = vmatprep.subr.bf16.mxu1 %v1230_v17  ;;  %v1232_v25 = vpack.c.bf16 %v115_v22, %v114_v20  ;;  %v84_v29 = vld [vmem:[#allocation5 + $0x20] sm:$0xff]  ;;  %v1234_v30 = vpack.c.bf16 %v133_v28, %v132_v27  ;;  %v85_v31 = vld [vmem:[#allocation5 + $0x28] sm:$0xff]  ;;  %v102_v35 = vld [vmem:[#allocation5 + $0xb0] sm:$0xff]  ;;  %p1533_p0 = pnand %p1532_p13, %p1526_p10 }
  0x3f   :  { %v116_v32 = vld [vmem:[#allocation5 + $0x120] sm:$0xff]  ;;  %v117_v33 = vld [vmem:[#allocation5 + $0x128] sm:$0xff]  ;;  %v1204_v34 = vpack.c.bf16 %v85_v31, %v84_v29  ;;  %v103_v36 = vld [vmem:[#allocation5 + $0xb8] sm:$0xff] }
  0x40   :  { %1201 = vmatpush3.bf16.msra.mxu0 %v1200_v21  ;;  %v134_v37 = vld [vmem:[#allocation5 + $0x1b0] sm:$0xff]  ;;  %v1236_v38 = vpack.c.bf16 %v117_v33, %v116_v32  ;;  %v1206_v39 = vpack.c.bf16 %v103_v36, %v102_v35  ;;  %v135_v40 = vld [vmem:[#allocation5 + $0x1b8] sm:$0xff]  ;;  %v104_v46 = vld [vmem:[#allocation5 + $0xc0] sm:$0xff] }
  0x41   :  { %1233 = vmatpush3.bf16.msra.mxu1 %v1232_v25  ;;  %1203 = vmatprep.subr.bf16.mxu0 %v1202_v26  ;;  %v86_v41 = vld [vmem:[#allocation5 + $0x30] sm:$0xff]  ;;  %v87_v42 = vld [vmem:[#allocation5 + $0x38] sm:$0xff]  ;;  %v1238_v43 = vpack.c.bf16 %v135_v40, %v134_v37  ;;  %v105_v47 = vld [vmem:[#allocation5 + $0xc8] sm:$0xff] }
  0x42   :  { %1235 = vmatprep.subr.bf16.mxu1 %v1234_v30  ;;  %v118_v44 = vld [vmem:[#allocation5 + $0x130] sm:$0xff]  ;;  %v119_v45 = vld [vmem:[#allocation5 + $0x138] sm:$0xff]  ;;  %v136_v48 = vld [vmem:[#allocation5 + $0x1c0] sm:$0xff]  ;;  %v1208_v50 = vpack.c.bf16 %v87_v42, %v86_v41  ;;  %v1210_v52 = vpack.c.bf16 %v105_v47, %v104_v46 }
  0x43   :  { %v137_v49 = vld [vmem:[#allocation5 + $0x1c8] sm:$0xff]  ;;  %v1240_v51 = vpack.c.bf16 %v119_v45, %v118_v44  ;;  %v88_v53 = vld [vmem:[#allocation5 + $0x40] sm:$0xff]  ;;  %v106_v58 = vld [vmem:[#allocation5 + $0xd0] sm:$0xff] }
  0x44   :  { %1205 = vmatpush3.bf16.msra.mxu0 %v1204_v34  ;;  %v89_v54 = vld [vmem:[#allocation5 + $0x48] sm:$0xff]  ;;  %v120_v55 = vld [vmem:[#allocation5 + $0x140] sm:$0xff]  ;;  %v1242_v56 = vpack.c.bf16 %v137_v49, %v136_v48  ;;  %v107_v59 = vld [vmem:[#allocation5 + $0xd8] sm:$0xff] }
  0x45   :  { %1237 = vmatpush3.bf16.msra.mxu1 %v1236_v38  ;;  %1207 = vmatprep.subr.bf16.mxu0 %v1206_v39  ;;  %v121_v57 = vld [vmem:[#allocation5 + $0x148] sm:$0xff]  ;;  %v138_v60 = vld [vmem:[#allocation5 + $0x1d0] sm:$0xff]  ;;  %v139_v61 = vld [vmem:[#allocation5 + $0x1d8] sm:$0xff]  ;;  %v1212_v62 = vpack.c.bf16 %v89_v54, %v88_v53  ;;  %v1214_v0 = vpack.c.bf16 %v107_v59, %v106_v58 }
  0x46   :  { %1239 = vmatprep.subr.bf16.mxu1 %v1238_v43  ;;  %v1244_v63 = vpack.c.bf16 %v121_v57, %v120_v55  ;;  %v90_v1 = vld [vmem:[#allocation5 + $0x50] sm:$0xff]  ;;  %v91_v2 = vld [vmem:[#allocation5 + $0x58] sm:$0xff]  ;;  %v1246_v4 = vpack.c.bf16 %v139_v61, %v138_v60  ;;  %v108_v6 = vld [vmem:[#allocation5 + $0xe0] sm:$0xff] }
  0x47   :  { %v122_v3 = vld [vmem:[#allocation5 + $0x150] sm:$0xff]  ;;  %v123_v5 = vld [vmem:[#allocation5 + $0x158] sm:$0xff]  ;;  %v109_v7 = vld [vmem:[#allocation5 + $0xe8] sm:$0xff]  ;;  %v1216_v10 = vpack.c.bf16 %v91_v2, %v90_v1 }
  0x48   :  { %1209 = vmatpush3.bf16.msra.mxu0 %v1208_v50  ;;  %v140_v8 = vld [vmem:[#allocation5 + $0x1e0] sm:$0xff]  ;;  %v141_v9 = vld [vmem:[#allocation5 + $0x1e8] sm:$0xff]  ;;  %v1248_v13 = vpack.c.bf16 %v123_v5, %v122_v3  ;;  %v1218_v14 = vpack.c.bf16 %v109_v7, %v108_v6  ;;  %v59_v17 = vld [vmem:[#allocation2 + $0x18] sm:$0xff] }
  0x49   :  { %1241 = vmatpush3.bf16.msra.mxu1 %v1240_v51  ;;  %1211 = vmatprep.subr.bf16.mxu0 %v1210_v52  ;;  %v92_v11 = vld [vmem:[#allocation5 + $0x60] sm:$0xff]  ;;  %v93_v12 = vld [vmem:[#allocation5 + $0x68] sm:$0xff]  ;;  %v1250_v18 = vpack.c.bf16 %v141_v9, %v140_v8  ;;  %v110_v20 = vld [vmem:[#allocation5 + $0xf0] sm:$0xff] }
  0x4a   :  { %1243 = vmatprep.subr.bf16.mxu1 %v1242_v56  ;;  %v124_v15 = vld [vmem:[#allocation5 + $0x160] sm:$0xff]  ;;  %v57_v16 = vld [vmem:[#allocation2 + $0x8] sm:$0xff]  ;;  %v111_v21 = vld [vmem:[#allocation5 + $0xf8] sm:$0xff]  ;;  %352 = vmatprep.mubr.f32.mxu1 %v59_v17  ;;  %v1220_v24 = vpack.c.bf16 %v93_v12, %v92_v11 }
  0x4b   :  { %v125_v19 = vld [vmem:[#allocation5 + $0x168] sm:$0xff]  ;;  %272 = vmatprep.mubr.f32.mxu0 %v57_v16  ;;  %v142_v22 = vld [vmem:[#allocation5 + $0x1f0] sm:$0xff]  ;;  %v143_v23 = vld [vmem:[#allocation5 + $0x1f8] sm:$0xff]  ;;  %v1222_v26 = vpack.c.bf16 %v111_v21, %v110_v20 }
  0x4c   :  { %1213 = vmatpush3.bf16.msra.mxu0 %v1212_v62  ;;  %v1252_v25 = vpack.c.bf16 %v125_v19, %v124_v15  ;;  %v94_v27 = vld [vmem:[#allocation5 + $0x70] sm:$0xff]  ;;  %v95_v28 = vld [vmem:[#allocation5 + $0x78] sm:$0xff]  ;;  %v1254_v30 = vpack.c.bf16 %v143_v23, %v142_v22  ;;  %v160_v32 = vld [vmem:[#allocation5 + $0x280] sm:$0xff] }
  0x4d   :  { %1245 = vmatpush3.bf16.msra.mxu1 %v1244_v63  ;;  %1215 = vmatprep.subr.bf16.mxu0 %v1214_v0  ;;  %v126_v29 = vld [vmem:[#allocation5 + $0x170] sm:$0xff]  ;;  %v127_v31 = vld [vmem:[#allocation5 + $0x178] sm:$0xff]  ;;  %v161_v33 = vld [vmem:[#allocation5 + $0x288] sm:$0xff]  ;;  %v1224_v36 = vpack.c.bf16 %v95_v28, %v94_v27 }
  0x4e   :  { %1247 = vmatprep.subr.bf16.mxu1 %v1246_v4  ;;  %v192_v34 = vld [vmem:[#allocation5 + $0x380] sm:$0xff]  ;;  %v193_v35 = vld [vmem:[#allocation5 + $0x388] sm:$0xff]  ;;  %v1256_v37 = vpack.c.bf16 %v127_v31, %v126_v29  ;;  %v1258_v38 = vpack.c.bf16 %v161_v33, %v160_v32  ;;  %v162_v44 = vld [vmem:[#allocation5 + $0x290] sm:$0xff] }
  0x4f   :  { %v144_v39 = vld [vmem:[#allocation5 + $0x200] sm:$0xff]  ;;  %v145_v40 = vld [vmem:[#allocation5 + $0x208] sm:$0xff]  ;;  %v1290_v42 = vpack.c.bf16 %v193_v35, %v192_v34  ;;  %v163_v45 = vld [vmem:[#allocation5 + $0x298] sm:$0xff] }
  0x50   :  { %1217 = vmatpush3.bf16.msra.mxu0 %v1216_v10  ;;  %v176_v41 = vld [vmem:[#allocation5 + $0x300] sm:$0xff]  ;;  %v177_v43 = vld [vmem:[#allocation5 + $0x308] sm:$0xff]  ;;  %v194_v46 = vld [vmem:[#allocation5 + $0x390] sm:$0xff]  ;;  %v1260_v50 = vpack.c.bf16 %v145_v40, %v144_v39  ;;  %v1262_v52 = vpack.c.bf16 %v163_v45, %v162_v44 }
  0x51   :  { %1249 = vmatpush3.bf16.msra.mxu1 %v1248_v13  ;;  %1219 = vmatprep.subr.bf16.mxu0 %v1218_v14  ;;  %v195_v47 = vld [vmem:[#allocation5 + $0x398] sm:$0xff]  ;;  %v56_v48 = vld [vmem:[#allocation2] sm:$0xff]  ;;  %v58_v49 = vld [vmem:[#allocation2 + $0x10] sm:$0xff]  ;;  %v1292_v51 = vpack.c.bf16 %v177_v43, %v176_v41 }
  0x52   :  { %1251 = vmatprep.subr.bf16.mxu1 %v1250_v18  ;;  %v146_v53 = vld [vmem:[#allocation5 + $0x210] sm:$0xff]  ;;  %v147_v54 = vld [vmem:[#allocation5 + $0x218] sm:$0xff]  ;;  %v1294_v56 = vpack.c.bf16 %v195_v47, %v194_v46  ;;  %v164_v58 = vld [vmem:[#allocation5 + $0x2a0] sm:$0xff] }
  0x53   :  { %v178_v55 = vld [vmem:[#allocation5 + $0x310] sm:$0xff]  ;;  %v179_v57 = vld [vmem:[#allocation5 + $0x318] sm:$0xff]  ;;  %v165_v59 = vld [vmem:[#allocation5 + $0x2a8] sm:$0xff]  ;;  %v1264_v62 = vpack.c.bf16 %v147_v54, %v146_v53 }
  0x54   :  { %1221 = vmatpush3.bf16.msra.mxu0 %v1220_v24  ;;  %v196_v60 = vld [vmem:[#allocation5 + $0x3a0] sm:$0xff]  ;;  %v197_v61 = vld [vmem:[#allocation5 + $0x3a8] sm:$0xff]  ;;  %v1296_v2 = vpack.c.bf16 %v179_v57, %v178_v55  ;;  %v1266_v3 = vpack.c.bf16 %v165_v59, %v164_v58  ;;  %v166_v5 = vld [vmem:[#allocation5 + $0x2b0] sm:$0xff] }
  0x55   :  { %1253 = vmatpush3.bf16.msra.mxu1 %v1252_v25  ;;  %1223 = vmatprep.subr.bf16.mxu0 %v1222_v26  ;;  %v148_v63 = vld [vmem:[#allocation5 + $0x220] sm:$0xff]  ;;  %v149_v0 = vld [vmem:[#allocation5 + $0x228] sm:$0xff]  ;;  %v167_v6 = vld [vmem:[#allocation5 + $0x2b8] sm:$0xff]  ;;  %v1298_v7 = vpack.c.bf16 %v197_v61, %v196_v60 }
  0x56   :  { %1255 = vmatprep.subr.bf16.mxu1 %v1254_v30  ;;  %v180_v1 = vld [vmem:[#allocation5 + $0x320] sm:$0xff]  ;;  %v181_v4 = vld [vmem:[#allocation5 + $0x328] sm:$0xff]  ;;  %v198_v8 = vld [vmem:[#allocation5 + $0x3b0] sm:$0xff]  ;;  %v1268_v14 = vpack.c.bf16 %v149_v0, %v148_v63  ;;  %v1270_v19 = vpack.c.bf16 %v167_v6, %v166_v5 }
  0x57   :  { %v65_v9 = vld [vmem:[#allocation2 + $0x48] sm:$0xff]  ;;  %v67_v10 = vld [vmem:[#allocation2 + $0x58] sm:$0xff]  ;;  %v64_v12 = vld [vmem:[#allocation2 + $0x40] sm:$0xff]  ;;  %v1300_v18 = vpack.c.bf16 %v181_v4, %v180_v1 }
  0x58   :  { %1225 = vmatpush3.bf16.msra.mxu0 %v1224_v36  ;;  %v199_v11 = vld [vmem:[#allocation5 + $0x3b8] sm:$0xff]  ;;  %v66_v13 = vld [vmem:[#allocation2 + $0x50] sm:$0xff]  ;;  %v168_v21 = vld [vmem:[#allocation5 + $0x2c0] sm:$0xff] }
  0x59   :  { %1257 = vmatpush3.bf16.msra.mxu1 %v1256_v37  ;;  %1259 = vmatprep.subr.bf16.mxu0 %v1258_v38  ;;  %v150_v15 = vld [vmem:[#allocation5 + $0x230] sm:$0xff]  ;;  %v151_v16 = vld [vmem:[#allocation5 + $0x238] sm:$0xff]  ;;  %v169_v22 = vld [vmem:[#allocation5 + $0x2c8] sm:$0xff]  ;;  %v1302_v23 = vpack.c.bf16 %v199_v11, %v198_v8 }
  0x5a   :  { %1291 = vmatprep.subr.bf16.mxu1 %v1290_v42  ;;  %v182_v17 = vld [vmem:[#allocation5 + $0x330] sm:$0xff]  ;;  %v183_v20 = vld [vmem:[#allocation5 + $0x338] sm:$0xff]  ;;  %v200_v24 = vld [vmem:[#allocation5 + $0x3c0] sm:$0xff]  ;;  %v1272_v30 = vpack.c.bf16 %v151_v16, %v150_v15  ;;  %v1274_v33 = vpack.c.bf16 %v169_v22, %v168_v21 }
  0x5b   :  { %273 = vmatmul.mubr.f32.vlgmr.msra.gmra.mrb[0].mxu0 %v56_v48  ;;  %v73_v25 = vld [vmem:[#allocation2 + $0x88] sm:$0xff]  ;;  %v75_v26 = vld [vmem:[#allocation2 + $0x98] sm:$0xff]  ;;  %v72_v28 = vld [vmem:[#allocation2 + $0x80] sm:$0xff]  ;;  %v1304_v32 = vpack.c.bf16 %v183_v20, %v182_v17 }
  0x5c   :  { %353 = vmatmul.mubr.f32.vlgmr.msra.gmra.mrb[0].mxu1 %v58_v49  ;;  %1261 = vmatpush3.bf16.msra.mxu0 %v1260_v50  ;;  %v201_v27 = vld [vmem:[#allocation5 + $0x3c8] sm:$0xff]  ;;  %v74_v29 = vld [vmem:[#allocation2 + $0x90] sm:$0xff]  ;;  %v152_v31 = vld [vmem:[#allocation5 + $0x240] sm:$0xff] }
  0x5d   :  { %1293 = vmatpush3.bf16.msra.mxu1 %v1292_v51  ;;  %1263 = vmatprep.subr.bf16.mxu0 %v1262_v52  ;;  %v153_v34 = vld [vmem:[#allocation5 + $0x248] sm:$0xff]  ;;  %v184_v35 = vld [vmem:[#allocation5 + $0x340] sm:$0xff]  ;;  %v1306_v37 = vpack.c.bf16 %v201_v27, %v200_v24  ;;  %v170_v38 = vld [vmem:[#allocation5 + $0x2d0] sm:$0xff] }
  0x5e   :  { %1295 = vmatprep.subr.bf16.mxu1 %v1294_v56  ;;  %277 = vmatprep.mubr.f32.mxu0 %v65_v9  ;;  %v185_v36 = vld [vmem:[#allocation5 + $0x348] sm:$0xff]  ;;  %v171_v39 = vld [vmem:[#allocation5 + $0x2d8] sm:$0xff]  ;;  %v202_v41 = vld [vmem:[#allocation5 + $0x3d0] sm:$0xff]  ;;  %v1276_v44 = vpack.c.bf16 %v153_v34, %v152_v31 }
  0x5f   :  { %357 = vmatprep.mubr.f32.mxu1 %v67_v10  ;;  %278 = vmatmul.mubr.f32.gmra.mrb[2].mxu0 %v64_v12  ;;  %v61_v40 = vld [vmem:[#allocation2 + $0x28] sm:$0xff]  ;;  %v203_v42 = vld [vmem:[#allocation5 + $0x3d8] sm:$0xff]  ;;  %v1308_v45 = vpack.c.bf16 %v185_v36, %v184_v35  ;;  %v1278_v46 = vpack.c.bf16 %v171_v39, %v170_v38  ;;  %v154_v47 = vld [vmem:[#allocation5 + $0x250] sm:$0xff] }
  0x60   :  { %1265 = vmatpush3.bf16.msra.mxu0 %v1264_v62  ;;  %358 = vmatmul.mubr.f32.gmra.mrb[2].mxu1 %v66_v13  ;;  %v63_v43 = vld [vmem:[#allocation2 + $0x38] sm:$0xff]  ;;  %v186_v49 = vld [vmem:[#allocation5 + $0x350] sm:$0xff]  ;;  %v1310_v50 = vpack.c.bf16 %v203_v42, %v202_v41  ;;  %v172_v52 = vld [vmem:[#allocation5 + $0x2e0] sm:$0xff] }
  0x61   :  { %1297 = vmatpush3.bf16.msra.mxu1 %v1296_v2  ;;  %1267 = vmatprep.subr.bf16.mxu0 %v1266_v3  ;;  %v155_v48 = vld [vmem:[#allocation5 + $0x258] sm:$0xff]  ;;  %v173_v53 = vld [vmem:[#allocation5 + $0x2e8] sm:$0xff]  ;;  %v204_v54 = vld [vmem:[#allocation5 + $0x3e0] sm:$0xff] }
  0x62   :  { %1299 = vmatprep.subr.bf16.mxu1 %v1298_v7  ;;  %282 = vmatprep.mubr.f32.mxu0 %v73_v25  ;;  %v187_v51 = vld [vmem:[#allocation5 + $0x358] sm:$0xff]  ;;  %v205_v55 = vld [vmem:[#allocation5 + $0x3e8] sm:$0xff]  ;;  %v1280_v56 = vpack.c.bf16 %v155_v48, %v154_v47  ;;  %v1282_v58 = vpack.c.bf16 %v173_v53, %v172_v52  ;;  %v156_v59 = vld [vmem:[#allocation5 + $0x260] sm:$0xff] }
  0x63   :  { %362 = vmatprep.mubr.f32.mxu1 %v75_v26  ;;  %283 = vmatmul.mubr.f32.gmra.mrb[4].mxu0 %v72_v28  ;;  %v1312_v57 = vpack.c.bf16 %v187_v51, %v186_v49  ;;  %v157_v60 = vld [vmem:[#allocation5 + $0x268] sm:$0xff]  ;;  %v188_v61 = vld [vmem:[#allocation5 + $0x360] sm:$0xff]  ;;  %v1314_v62 = vpack.c.bf16 %v205_v55, %v204_v54  ;;  %v174_v0 = vld [vmem:[#allocation5 + $0x2f0] sm:$0xff] }
  0x64   :  { %1269 = vmatpush3.bf16.msra.mxu0 %v1268_v14  ;;  %363 = vmatmul.mubr.f32.gmra.mrb[4].mxu1 %v74_v29  ;;  %v189_v63 = vld [vmem:[#allocation5 + $0x368] sm:$0xff]  ;;  %v175_v1 = vld [vmem:[#allocation5 + $0x2f8] sm:$0xff]  ;;  %v206_v2 = vld [vmem:[#allocation5 + $0x3f0] sm:$0xff]  ;;  %v1284_v4 = vpack.c.bf16 %v157_v60, %v156_v59 }
  0x65   :  { %1301 = vmatpush3.bf16.msra.mxu1 %v1300_v18  ;;  %1271 = vmatprep.subr.bf16.mxu0 %v1270_v19  ;;  %v207_v3 = vld [vmem:[#allocation5 + $0x3f8] sm:$0xff]  ;;  %v1316_v5 = vpack.c.bf16 %v189_v63, %v188_v61  ;;  %v1286_v6 = vpack.c.bf16 %v175_v1, %v174_v0  ;;  %v158_v7 = vld [vmem:[#allocation5 + $0x270] sm:$0xff]  ;;  %v60_v14 = vld [vmem:[#allocation2 + $0x20] sm:$0xff] }
  0x66   :  { %1303 = vmatprep.subr.bf16.mxu1 %v1302_v23  ;;  %432 = vmatprep.mubr.f32.mxu0 %v61_v40  ;;  %v159_v8 = vld [vmem:[#allocation5 + $0x278] sm:$0xff]  ;;  %v1318_v9 = vpack.c.bf16 %v207_v3, %v206_v2  ;;  %v190_v10 = vld [vmem:[#allocation5 + $0x370] sm:$0xff]  ;;  %v69_v16 = vld [vmem:[#allocation2 + $0x68] sm:$0xff] }
  0x67   :  { %512 = vmatprep.mubr.f32.mxu1 %v63_v43  ;;  %v191_v11 = vld [vmem:[#allocation5 + $0x378] sm:$0xff]  ;;  %v1288_v12 = vpack.c.bf16 %v159_v8, %v158_v7  ;;  %v62_v15 = vld [vmem:[#allocation2 + $0x30] sm:$0xff]  ;;  %v68_v18 = vld [vmem:[#allocation2 + $0x60] sm:$0xff] }
  0x68   :  { %1273 = vmatpush3.bf16.msra.mxu0 %v1272_v30  ;;  %v1320_v13 = vpack.c.bf16 %v191_v11, %v190_v10  ;;  %v71_v17 = vld [vmem:[#allocation2 + $0x78] sm:$0xff]  ;;  %v70_v19 = vld [vmem:[#allocation2 + $0x70] sm:$0xff]  ;;  %v77_v20 = vld [vmem:[#allocation2 + $0xa8] sm:$0xff] }
  0x69   :  { %1305 = vmatpush3.bf16.msra.mxu1 %v1304_v32  ;;  %1275 = vmatprep.subr.bf16.mxu0 %v1274_v33  ;;  %v79_v21 = vld [vmem:[#allocation2 + $0xb8] sm:$0xff]  ;;  %v76_v22 = vld [vmem:[#allocation2 + $0xa0] sm:$0xff]  ;;  %v78_v23 = vld [vmem:[#allocation2 + $0xb0] sm:$0xff] }
  0x6a   :  { %1307 = vmatprep.subr.bf16.mxu1 %v1306_v37  ;;  %v529_v24 = vld [vmem:[#allocation7 + $0x8] sm:$0xff]  ;;  %v531_v26 = vld [vmem:[#allocation7 + $0x18] sm:$0xff]  ;;  %v528_v29 = vld [vmem:[#allocation7] sm:$0xff] }
  0x6b   :  { %v537_v25 = vld [vmem:[#allocation7 + $0x48] sm:$0xff]  ;;  %v539_v28 = vld [vmem:[#allocation7 + $0x58] sm:$0xff]  ;;  %v536_v30 = vld [vmem:[#allocation7 + $0x40] sm:$0xff] }
  0x6c   :  { %1277 = vmatpush3.bf16.msra.mxu0 %v1276_v44  ;;  %v1322_v27 = vpack.c.bf16 %v537_v25, %v529_v24  ;;  %v1354_v31 = vpack.c.bf16 %v539_v28, %v531_v26  ;;  %v1324_v32 = vpack.c.bf16 %v536_v30, %v528_v29  ;;  %v530_v33 = vld [vmem:[#allocation7 + $0x10] sm:$0xff]  ;;  %v545_v35 = vld [vmem:[#allocation7 + $0x88] sm:$0xff]  ;;  %v547_v38 = vld [vmem:[#allocation7 + $0x98] sm:$0xff] }
  0x6d   :  { %1309 = vmatpush3.bf16.msra.mxu1 %v1308_v45  ;;  %1279 = vmatprep.subr.bf16.mxu0 %v1278_v46  ;;  %v538_v34 = vld [vmem:[#allocation7 + $0x50] sm:$0xff]  ;;  %v553_v37 = vld [vmem:[#allocation7 + $0xc8] sm:$0xff]  ;;  %v555_v39 = vld [vmem:[#allocation7 + $0xd8] sm:$0xff] }
  0x6e   :  { %1311 = vmatprep.subr.bf16.mxu1 %v1310_v50  ;;  %v1356_v36 = vpack.c.bf16 %v538_v34, %v530_v33  ;;  %v1326_v40 = vpack.c.bf16 %v553_v37, %v545_v35  ;;  %v1358_v41 = vpack.c.bf16 %v555_v39, %v547_v38  ;;  %v544_v42 = vld [vmem:[#allocation7 + $0x80] sm:$0xff]  ;;  %v546_v44 = vld [vmem:[#allocation7 + $0x90] sm:$0xff]  ;;  %v561_v47 = vld [vmem:[#allocation7 + $0x108] sm:$0xff] }
  0x6f   :  { %v552_v43 = vld [vmem:[#allocation7 + $0xc0] sm:$0xff]  ;;  %v554_v46 = vld [vmem:[#allocation7 + $0xd0] sm:$0xff]  ;;  %v569_v48 = vld [vmem:[#allocation7 + $0x148] sm:$0xff] }
  0x70   :  { %1281 = vmatpush3.bf16.msra.mxu0 %v1280_v56  ;;  %v1328_v45 = vpack.c.bf16 %v552_v43, %v544_v42  ;;  %v1360_v49 = vpack.c.bf16 %v554_v46, %v546_v44  ;;  %v1330_v50 = vpack.c.bf16 %v569_v48, %v561_v47  ;;  %v563_v51 = vld [vmem:[#allocation7 + $0x118] sm:$0xff]  ;;  %v560_v53 = vld [vmem:[#allocation7 + $0x100] sm:$0xff]  ;;  %v562_v56 = vld [vmem:[#allocation7 + $0x110] sm:$0xff] }
  0x71   :  { %1313 = vmatpush3.bf16.msra.mxu1 %v1312_v57  ;;  %1283 = vmatprep.subr.bf16.mxu0 %v1282_v58  ;;  %v571_v52 = vld [vmem:[#allocation7 + $0x158] sm:$0xff]  ;;  %v568_v55 = vld [vmem:[#allocation7 + $0x140] sm:$0xff]  ;;  %v570_v57 = vld [vmem:[#allocation7 + $0x150] sm:$0xff] }
  0x72   :  { %1315 = vmatprep.subr.bf16.mxu1 %v1314_v62  ;;  %v1362_v54 = vpack.c.bf16 %v571_v52, %v563_v51  ;;  %v1332_v58 = vpack.c.bf16 %v568_v55, %v560_v53  ;;  %v577_v59 = vld [vmem:[#allocation7 + $0x188] sm:$0xff]  ;;  %v579_v61 = vld [vmem:[#allocation7 + $0x198] sm:$0xff]  ;;  %v1364_v62 = vpack.c.bf16 %v570_v57, %v562_v56  ;;  %v576_v1 = vld [vmem:[#allocation7 + $0x180] sm:$0xff] }
  0x73   :  { %v585_v60 = vld [vmem:[#allocation7 + $0x1c8] sm:$0xff]  ;;  %v587_v0 = vld [vmem:[#allocation7 + $0x1d8] sm:$0xff]  ;;  %v584_v2 = vld [vmem:[#allocation7 + $0x1c0] sm:$0xff] }
  0x74   :  { %1285 = vmatpush3.bf16.msra.mxu0 %v1284_v4  ;;  %v1334_v63 = vpack.c.bf16 %v585_v60, %v577_v59  ;;  %v1366_v3 = vpack.c.bf16 %v587_v0, %v579_v61  ;;  %v578_v4 = vld [vmem:[#allocation7 + $0x190] sm:$0xff]  ;;  %v601_v7 = vld [vmem:[#allocation7 + $0x248] sm:$0xff]  ;;  %v595_v8 = vld [vmem:[#allocation7 + $0x218] sm:$0xff]  ;;  %v1336_v10 = vpack.c.bf16 %v584_v2, %v576_v1 }
  0x75   :  { %1317 = vmatpush3.bf16.msra.mxu1 %v1316_v5  ;;  %1287 = vmatprep.subr.bf16.mxu0 %v1286_v6  ;;  %v586_v5 = vld [vmem:[#allocation7 + $0x1d0] sm:$0xff]  ;;  %v593_v6 = vld [vmem:[#allocation7 + $0x208] sm:$0xff]  ;;  %v608_v25 = vld [vmem:[#allocation7 + $0x280] sm:$0xff] }
  0x76   :  { %1319 = vmatprep.subr.bf16.mxu1 %v1318_v9  ;;  %v603_v9 = vld [vmem:[#allocation7 + $0x258] sm:$0xff]  ;;  %v1368_v11 = vpack.c.bf16 %v586_v5, %v578_v4  ;;  %v616_v26 = vld [vmem:[#allocation7 + $0x2c0] sm:$0xff]  ;;  %v618_v29 = vld [vmem:[#allocation7 + $0x2d0] sm:$0xff] }
  0x77   :  { %v625_v30 = vld [vmem:[#allocation7 + $0x308] sm:$0xff]  ;;  %v635_v33 = vld [vmem:[#allocation7 + $0x358] sm:$0xff]  ;;  %v1344_v34 = vpack.c.bf16 %v616_v26, %v608_v25  ;;  %v624_v38 = vld [vmem:[#allocation7 + $0x300] sm:$0xff] }
  0x78   :  { %1289 = vmatpush3.bf16.msra.mxu0 %v1288_v12  ;;  %v1338_v12 = vpack.c.bf16 %v601_v7, %v593_v6  ;;  %v632_v39 = vld [vmem:[#allocation7 + $0x340] sm:$0xff]  ;;  %v634_v42 = vld [vmem:[#allocation7 + $0x350] sm:$0xff]  ;;  %v641_v44 = vld [vmem:[#allocation7 + $0x388] sm:$0xff] }
  0x79   :  { %1321 = vmatpush3.bf16.msra.mxu1 %v1320_v13  ;;  %1323 = vmatprep.subr.bf16.mxu0 %v1322_v27  ;;  %v592_v13 = vld [vmem:[#allocation7 + $0x200] sm:$0xff]  ;;  %v610_v27 = vld [vmem:[#allocation7 + $0x290] sm:$0xff]  ;;  %v643_v46 = vld [vmem:[#allocation7 + $0x398] sm:$0xff] }
  0x7a   :  { %1355 = vmatprep.subr.bf16.mxu1 %v1354_v31  ;;  %v633_v31 = vld [vmem:[#allocation7 + $0x348] sm:$0xff]  ;;  %v1376_v35 = vpack.c.bf16 %v618_v29, %v610_v27  ;;  %v651_v48 = vld [vmem:[#allocation7 + $0x3d8] sm:$0xff]  ;;  %v642_v53 = vld [vmem:[#allocation7 + $0x390] sm:$0xff] }
  0x7b   :  { %433 = vmatmul.mubr.f32.vlgmr.msra.gmra.mrb[6].mxu0 %v60_v14  ;;  %v600_v14 = vld [vmem:[#allocation7 + $0x240] sm:$0xff]  ;;  %v1382_v51 = vpack.c.bf16 %v651_v48, %v643_v46  ;;  %v533_v56 = vld [vmem:[#allocation7 + $0x28] sm:$0xff]  ;;  %v543_v60 = vld [vmem:[#allocation7 + $0x78] sm:$0xff] }
  0x7c   :  { %513 = vmatmul.mubr.f32.vlgmr.msra.gmra.mrb[6].mxu1 %v62_v15  ;;  %437 = vmatprep.mubr.f32.mxu0 %v69_v16  ;;  %v594_v15 = vld [vmem:[#allocation7 + $0x210] sm:$0xff]  ;;  %v1370_v16 = vpack.c.bf16 %v603_v9, %v595_v8  ;;  %v541_v57 = vld [vmem:[#allocation7 + $0x68] sm:$0xff]  ;;  %v540_v26 = vld [vmem:[#allocation7 + $0x60] sm:$0xff] }
  0x7d   :  { %517 = vmatprep.mubr.f32.mxu1 %v71_v17  ;;  %1325 = vmatpush1.bf16.msra.mxu0 %v1324_v32  ;;  %v602_v17 = vld [vmem:[#allocation7 + $0x250] sm:$0xff]  ;;  %v627_v32 = vld [vmem:[#allocation7 + $0x318] sm:$0xff]  ;;  %v1386_v59 = vpack.c.bf16 %v541_v57, %v533_v56 }
  0x7e   :  { %1357 = vmatpush1.bf16.msra.mxu1 %v1356_v36  ;;  %1327 = vmatprep.subr.bf16.mxu0 %v1326_v40  ;;  %v1346_v36 = vpack.c.bf16 %v633_v31, %v625_v30  ;;  %v1378_v37 = vpack.c.bf16 %v635_v33, %v627_v32  ;;  %v626_v40 = vld [vmem:[#allocation7 + $0x310] sm:$0xff]  ;;  %v549_v30 = vld [vmem:[#allocation7 + $0xa8] sm:$0xff] }
  0x7f   :  { %438 = vmatmul.mubr.f32.gmra.mrb[8].mxu0 %v68_v18  ;;  %1359 = vmatprep.subr.bf16.mxu1 %v1358_v41  ;;  %v609_v18 = vld [vmem:[#allocation7 + $0x288] sm:$0xff]  ;;  %v1348_v41 = vpack.c.bf16 %v632_v39, %v624_v38  ;;  %v1380_v43 = vpack.c.bf16 %v634_v42, %v626_v40  ;;  %v534_v27 = vld [vmem:[#allocation7 + $0x30] sm:$0xff]  ;;  %v548_v40 = vld [vmem:[#allocation7 + $0xa0] sm:$0xff] }
  0x80   :  { %518 = vmatmul.mubr.f32.gmra.mrb[8].mxu1 %v70_v19  ;;  %442 = vmatprep.mubr.f32.mxu0 %v77_v20  ;;  %v617_v19 = vld [vmem:[#allocation7 + $0x2c8] sm:$0xff]  ;;  %v611_v20 = vld [vmem:[#allocation7 + $0x298] sm:$0xff]  ;;  %v558_v46 = vld [vmem:[#allocation7 + $0xf0] sm:$0xff] }
  0x81   :  { %522 = vmatprep.mubr.f32.mxu1 %v79_v21  ;;  %1329 = vmatpush1.bf16.msra.mxu0 %v1328_v45  ;;  %v619_v21 = vld [vmem:[#allocation7 + $0x2d8] sm:$0xff]  ;;  %v1342_v24 = vpack.c.bf16 %v617_v19, %v609_v18  ;;  %v649_v45 = vld [vmem:[#allocation7 + $0x3c8] sm:$0xff] }
  0x82   :  { %1361 = vmatpush1.bf16.msra.mxu1 %v1360_v49  ;;  %1331 = vmatprep.subr.bf16.mxu0 %v1330_v50  ;;  %v1374_v28 = vpack.c.bf16 %v619_v21, %v611_v20  ;;  %v1350_v47 = vpack.c.bf16 %v649_v45, %v641_v44  ;;  %v640_v49 = vld [vmem:[#allocation7 + $0x380] sm:$0xff]  ;;  %v557_v33 = vld [vmem:[#allocation7 + $0xe8] sm:$0xff]  ;;  %v550_v45 = vld [vmem:[#allocation7 + $0xb0] sm:$0xff] }
  0x83   :  { %443 = vmatmul.mubr.f32.gmra.mrb[10].mxu0 %v76_v22  ;;  %1363 = vmatprep.subr.bf16.mxu1 %v1362_v54  ;;  %v1340_v22 = vpack.c.bf16 %v600_v14, %v592_v13  ;;  %v648_v50 = vld [vmem:[#allocation7 + $0x3c0] sm:$0xff]  ;;  %v650_v54 = vld [vmem:[#allocation7 + $0x3d0] sm:$0xff]  ;;  %v1390_v48 = vpack.c.bf16 %v557_v33, %v549_v30  ;;  %v613_v33 = vld [vmem:[#allocation7 + $0x2a8] sm:$0xff] }
  0x84   :  { %523 = vmatmul.mubr.f32.gmra.mrb[10].mxu1 %v78_v23  ;;  %v1372_v23 = vpack.c.bf16 %v602_v17, %v594_v15  ;;  %v1352_v52 = vpack.c.bf16 %v648_v50, %v640_v49  ;;  %v1384_v55 = vpack.c.bf16 %v650_v54, %v642_v53  ;;  %v556_v44 = vld [vmem:[#allocation7 + $0xe0] sm:$0xff]  ;;  %v565_v50 = vld [vmem:[#allocation7 + $0x128] sm:$0xff]  ;;  %v567_v54 = vld [vmem:[#allocation7 + $0x138] sm:$0xff] }
  0x85   :  { %1333 = vmatpush1.bf16.msra.mxu0 %v1332_v58  ;;  %v535_v58 = vld [vmem:[#allocation7 + $0x38] sm:$0xff]  ;;  %v573_v53 = vld [vmem:[#allocation7 + $0x168] sm:$0xff] }
  0x86   :  { %1365 = vmatpush1.bf16.msra.mxu1 %v1364_v62  ;;  %1335 = vmatprep.subr.bf16.mxu0 %v1334_v63  ;;  %v1418_v61 = vpack.c.bf16 %v543_v60, %v535_v58  ;;  %v1560_v62 = vmov 0.0   ;;  %v1392_v58 = vpack.c.bf16 %v556_v44, %v548_v40  ;;  %v564_v60 = vld [vmem:[#allocation7 + $0x120] sm:$0xff]  ;;  %v614_v44 = vld [vmem:[#allocation7 + $0x2b0] sm:$0xff] }
  0x87   :  { %1367 = vmatprep.subr.bf16.mxu1 %v1366_v3  ;;  %720 = vmatprep.mubr.f32.mxu0 %v1560_v62  ;;  %v620_v40 = vld [vmem:[#allocation7 + $0x2e0] sm:$0xff] }
  0x88   :  { %803 = vmatprep.mubr.f32.mxu1 %v1560_v62 }
  0x89   :  { %1337 = vmatpush1.bf16.msra.mxu0 %v1336_v10 }
  0x8a   :  { %1369 = vmatpush1.bf16.msra.mxu1 %v1368_v11  ;;  %1339 = vmatprep.subr.bf16.mxu0 %v1338_v12 }
  0x8b   :  { %1371 = vmatprep.subr.bf16.mxu1 %v1370_v16 }
  0x8d   :  { %1341 = vmatpush1.bf16.msra.mxu0 %v1340_v22 }
  0x8e   :  { %1373 = vmatpush1.bf16.msra.mxu1 %v1372_v23  ;;  %1343 = vmatprep.subr.bf16.mxu0 %v1342_v24  ;;  %v532_v23 = vld [vmem:[#allocation7 + $0x20] sm:$0xff] }
  0x8f   :  { %1375 = vmatprep.subr.bf16.mxu1 %v1374_v28  ;;  %v542_v28 = vld [vmem:[#allocation7 + $0x70] sm:$0xff]  ;;  %v1388_v38 = vpack.c.bf16 %v540_v26, %v532_v23  ;;  %v599_v23 = vld [vmem:[#allocation7 + $0x238] sm:$0xff] }
  0x90   :  { %v1420_v39 = vpack.c.bf16 %v542_v28, %v534_v27  ;;  %v596_v27 = vld [vmem:[#allocation7 + $0x220] sm:$0xff] }
  0x91   :  { %1345 = vmatpush1.bf16.msra.mxu0 %v1344_v34  ;;  %v551_v34 = vld [vmem:[#allocation7 + $0xb8] sm:$0xff]  ;;  %v604_v28 = vld [vmem:[#allocation7 + $0x260] sm:$0xff] }
  0x92   :  { %1377 = vmatpush1.bf16.msra.mxu1 %v1376_v35  ;;  %1347 = vmatprep.subr.bf16.mxu0 %v1346_v36  ;;  %v559_v35 = vld [vmem:[#allocation7 + $0xf8] sm:$0xff] }
  0x93   :  { %1379 = vmatprep.subr.bf16.mxu1 %v1378_v37  ;;  %v1422_v49 = vpack.c.bf16 %v559_v35, %v551_v34  ;;  %v621_v34 = vld [vmem:[#allocation7 + $0x2e8] sm:$0xff]  ;;  %v615_v35 = vld [vmem:[#allocation7 + $0x2b8] sm:$0xff] }
  0x95   :  { %1349 = vmatpush1.bf16.msra.mxu0 %v1348_v41 }
  0x96   :  { %1381 = vmatpush1.bf16.msra.mxu1 %v1380_v43  ;;  %1351 = vmatprep.subr.bf16.mxu0 %v1350_v47 }
  0x97   :  { %1383 = vmatprep.subr.bf16.mxu1 %v1382_v51 }
  0x99   :  { %1353 = vmatpush1.bf16.msra.mxu0 %v1352_v52 }
  0x9a   :  { %1385 = vmatpush1.bf16.msra.mxu1 %v1384_v55  ;;  %1387 = vmatprep.subr.bf16.mxu0 %v1386_v59  ;;  %v575_v55 = vld [vmem:[#allocation7 + $0x178] sm:$0xff]  ;;  %v1424_v59 = vpack.c.bf16 %v558_v46, %v550_v45  ;;  %v622_v45 = vld [vmem:[#allocation7 + $0x2f0] sm:$0xff]  ;;  %v629_v46 = vld [vmem:[#allocation7 + $0x328] sm:$0xff] }
  0x9b   :  { %1419 = vmatprep.subr.bf16.mxu1 %v1418_v61  ;;  %v572_v61 = vld [vmem:[#allocation7 + $0x160] sm:$0xff] }
 0x12e   :  { %v1062_v63 = vpop.f32.mrb[0].mxu0 }
 0x12f   :  { %v1103_v0 = vpop.f32.mrb[0].mxu1  ;;  %v1063_v1 = vpop.f32.mrb[1].mxu0 }
 0x130   :  { %v1064_v2 = vadd.f32 %v1063_v1, %v1062_v63  ;;  %v1104_v3 = vpop.f32.mrb[1].mxu1 }
 0x131   :  { %v1105_v4 = vadd.f32 %v1104_v3, %v1103_v0  ;;  %v574_v3 = vld [vmem:[#allocation7 + $0x170] sm:$0xff] }
 0x132   :  { %v1065_v8 = vpop.f32.mrb[2].mxu0 }
 0x133   :  { %v355_v5 = vadd.f32 %v1105_v4, %v1064_v2  ;;  %v1106_v6 = vpop.f32.mrb[2].mxu1  ;;  %v1066_v10 = vpop.f32.mrb[3].mxu0  ;;  %v566_v2 = vld [vmem:[#allocation7 + $0x130] sm:$0xff]  ;;  %v581_v4 = vld [vmem:[#allocation7 + $0x1a8] sm:$0xff] }
 0x134   :  { %v1107_v7 = vpop.f32.mrb[3].mxu1  ;;  %v1067_v11 = vadd.f32 %v1066_v10, %v1065_v8  ;;  %v589_v8 = vld [vmem:[#allocation7 + $0x1e8] sm:$0xff]  ;;  %v591_v10 = vld [vmem:[#allocation7 + $0x1f8] sm:$0xff] }
 0x135   :  { %v1108_v9 = vadd.f32 %v1107_v7, %v1106_v6  ;;  %v1394_v6 = vpack.c.bf16 %v573_v53, %v565_v50  ;;  %v1426_v7 = vpack.c.bf16 %v575_v55, %v567_v54  ;;  %v636_v53 = vld [vmem:[#allocation7 + $0x360] sm:$0xff] }
 0x136   :  { %v1068_v15 = vpop.f32.mrb[4].mxu0 }
 0x137   :  { %v1109_v12 = vpop.f32.mrb[4].mxu1  ;;  %v360_v14 = vadd.f32 %v1108_v9, %v1067_v11  ;;  %v1069_v17 = vpop.f32.mrb[5].mxu0  ;;  %v583_v9 = vld [vmem:[#allocation7 + $0x1b8] sm:$0xff] }
 0x138   :  { %v1110_v13 = vpop.f32.mrb[5].mxu1  ;;  %v1070_v18 = vadd.f32 %v1069_v17, %v1068_v15  ;;  %v588_v15 = vld [vmem:[#allocation7 + $0x1e0] sm:$0xff]  ;;  %v1398_v17 = vpack.c.bf16 %v589_v8, %v581_v4 }
 0x139   :  { %v1111_v16 = vadd.f32 %v1110_v13, %v1109_v12  ;;  %v1396_v12 = vpack.c.bf16 %v572_v61, %v564_v60  ;;  %v1428_v13 = vpack.c.bf16 %v574_v3, %v566_v2  ;;  %v647_v60 = vld [vmem:[#allocation7 + $0x3b8] sm:$0xff]  ;;  %v644_v2 = vld [vmem:[#allocation7 + $0x3a0] sm:$0xff] }
 0x13a   :  { %v655_v61 = vld [vmem:[#allocation7 + $0x3f8] sm:$0xff] }
 0x13b   :  { %v1626_v19 = vadd.f32 %v1111_v16, %v1070_v18  ;;  %v1430_v18 = vpack.c.bf16 %v591_v10, %v583_v9  ;;  %v1446_v4 = vpack.c.bf16 %v655_v61, %v647_v60 }
 0x14e   :  { %v1144_v20 = vpop.f32.mrb[6].mxu0 }
 0x14f   :  { %v1145_v21 = vpop.f32.mrb[7].mxu0  ;;  %v1185_v22 = vpop.f32.mrb[6].mxu1 }
 0x150   :  { %v1146_v24 = vadd.f32 %v1145_v21, %v1144_v20  ;;  %v1186_v25 = vpop.f32.mrb[7].mxu1  ;;  %v582_v20 = vld [vmem:[#allocation7 + $0x1b0] sm:$0xff]  ;;  %v597_v21 = vld [vmem:[#allocation7 + $0x228] sm:$0xff] }
 0x151   :  { %v1187_v29 = vadd.f32 %v1186_v25, %v1185_v22  ;;  %v605_v22 = vld [vmem:[#allocation7 + $0x268] sm:$0xff] }
 0x152   :  { %v435_v31 = vadd.f32 %v1146_v24, %v355_v5  ;;  %v1147_v32 = vpop.f32.mrb[8].mxu0  ;;  %v607_v24 = vld [vmem:[#allocation7 + $0x278] sm:$0xff] }
 0x153   :  { %v1148_v36 = vpop.f32.mrb[9].mxu0  ;;  %v1188_v37 = vpop.f32.mrb[8].mxu1  ;;  %v1434_v30 = vpack.c.bf16 %v607_v24, %v599_v23 }
 0x154   :  { %v1628_v41 = vadd.f32 %v1187_v29, %v435_v31  ;;  %v1149_v42 = vadd.f32 %v1148_v36, %v1147_v32  ;;  %v1189_v43 = vpop.f32.mrb[9].mxu1  ;;  %v1402_v29 = vpack.c.bf16 %v605_v22, %v597_v21  ;;  %v598_v31 = vld [vmem:[#allocation7 + $0x230] sm:$0xff]  ;;  %v623_v36 = vld [vmem:[#allocation7 + $0x2f8] sm:$0xff] }
 0x155   :  { %v1190_v47 = vadd.f32 %v1189_v43, %v1188_v37  ;;  %v606_v32 = vld [vmem:[#allocation7 + $0x270] sm:$0xff]  ;;  %v1404_v37 = vpack.c.bf16 %v604_v28, %v596_v27  ;;  %v1438_v43 = vpack.c.bf16 %v623_v36, %v615_v35 }
 0x156   :  { %v440_v51 = vadd.f32 %v1149_v42, %v360_v14  ;;  %v1150_v52 = vpop.f32.mrb[10].mxu0  ;;  %721 = vmatmul.mubr.f32.vlgmr.msra.gmra.mrb[12].mxu0 %v1628_v41  ;;  %804 = vmatmul.mubr.f32.vlgmr.msra.gmra.mrb[12].mxu1 %v1628_v41  ;;  %v580_v14 = vld [vmem:[#allocation7 + $0x1a0] sm:$0xff]  ;;  %v1406_v42 = vpack.c.bf16 %v621_v34, %v613_v33 }
 0x157   :  { %1389 = vmatpush1.bf16.msra.mxu0 %v1388_v38  ;;  %1421 = vmatpush1.bf16.msra.mxu1 %v1420_v39  ;;  %v1151_v56 = vpop.f32.mrb[11].mxu0  ;;  %v1191_v57 = vpop.f32.mrb[10].mxu1  ;;  %v1400_v25 = vpack.c.bf16 %v588_v15, %v580_v14  ;;  %v1436_v38 = vpack.c.bf16 %v606_v32, %v598_v31  ;;  %v612_v39 = vld [vmem:[#allocation7 + $0x2a0] sm:$0xff] }
 0x158   :  { %v1632_v63 = vadd.f32 %v1190_v47, %v440_v51  ;;  %v1152_v0 = vadd.f32 %v1151_v56, %v1150_v52  ;;  %v1192_v1 = vpop.f32.mrb[11].mxu1  ;;  %726 = vmatprep.mubr.f32.mxu0 %v1560_v62  ;;  %809 = vmatprep.mubr.f32.mxu1 %v1560_v62  ;;  %v637_v47 = vld [vmem:[#allocation7 + $0x368] sm:$0xff]  ;;  %v1408_v50 = vpack.c.bf16 %v620_v40, %v612_v39  ;;  %v628_v52 = vld [vmem:[#allocation7 + $0x320] sm:$0xff]  ;;  %v630_v56 = vld [vmem:[#allocation7 + $0x330] sm:$0xff] }
 0x159   :  { %v1193_v5 = vadd.f32 %v1192_v1, %v1191_v57  ;;  %1391 = vmatprep.subr.bf16.mxu0 %v1390_v48  ;;  %1423 = vmatprep.subr.bf16.mxu1 %v1422_v49  ;;  %v631_v48 = vld [vmem:[#allocation7 + $0x338] sm:$0xff]  ;;  %v1440_v51 = vpack.c.bf16 %v622_v45, %v614_v44  ;;  %v1410_v54 = vpack.c.bf16 %v637_v47, %v629_v46  ;;  %v638_v57 = vld [vmem:[#allocation7 + $0x370] sm:$0xff] }
 0x15a   :  { %v445_v11 = vadd.f32 %v1152_v0, %v1626_v19  ;;  %727 = vmatmul.mubr.f32.gmra.mrb[14].mxu0 %v1632_v63  ;;  %810 = vmatmul.mubr.f32.gmra.mrb[14].mxu1 %v1632_v63  ;;  %v590_v19 = vld [vmem:[#allocation7 + $0x1f0] sm:$0xff]  ;;  %v639_v49 = vld [vmem:[#allocation7 + $0x378] sm:$0xff]  ;;  %v1412_v0 = vpack.c.bf16 %v636_v53, %v628_v52  ;;  %v1444_v1 = vpack.c.bf16 %v638_v57, %v630_v56 }
 0x15b   :  { %1393 = vmatpush1.bf16.msra.mxu0 %v1392_v58  ;;  %1425 = vmatpush1.bf16.msra.mxu1 %v1424_v59  ;;  %v1432_v26 = vpack.c.bf16 %v590_v19, %v582_v20  ;;  %v1442_v55 = vpack.c.bf16 %v639_v49, %v631_v48  ;;  %v645_v58 = vld [vmem:[#allocation7 + $0x3a8] sm:$0xff] }
 0x15c   :  { %v1639_v16 = vadd.f32 %v1193_v5, %v445_v11  ;;  %732 = vmatprep.mubr.f32.mxu0 %v1560_v62  ;;  %815 = vmatprep.mubr.f32.mxu1 %v1560_v62  ;;  %v653_v59 = vld [vmem:[#allocation7 + $0x3e8] sm:$0xff]  ;;  %v652_v5 = vld [vmem:[#allocation7 + $0x3e0] sm:$0xff] }
 0x15d   :  { %1395 = vmatprep.subr.bf16.mxu0 %v1394_v6  ;;  %1427 = vmatprep.subr.bf16.mxu1 %v1426_v7  ;;  %v1414_v3 = vpack.c.bf16 %v653_v59, %v645_v58  ;;  %v646_v6 = vld [vmem:[#allocation7 + $0x3b0] sm:$0xff]  ;;  %v1416_v8 = vpack.c.bf16 %v652_v5, %v644_v2 }
 0x15e   :  { %733 = vmatmul.mubr.f32.gmra.mrb[16].mxu0 %v1639_v16  ;;  %816 = vmatmul.mubr.f32.gmra.mrb[16].mxu1 %v1639_v16  ;;  %v654_v7 = vld [vmem:[#allocation7 + $0x3f0] sm:$0xff] }
 0x15f   :  { %1397 = vmatpush1.bf16.msra.mxu0 %v1396_v12  ;;  %1429 = vmatpush1.bf16.msra.mxu1 %v1428_v13  ;;  %v1448_v9 = vpack.c.bf16 %v654_v7, %v646_v6 }
 0x160   :  { %1399 = vmatprep.subr.bf16.mxu0 %v1398_v17  ;;  %1431 = vmatprep.subr.bf16.mxu1 %v1430_v18 }
 0x161   :  { %886 = vmatprep.mubr.f32.mxu0 %v1560_v62  ;;  %969 = vmatprep.mubr.f32.mxu1 %v1560_v62 }
 0x163   :  { %1401 = vmatpush1.bf16.msra.mxu0 %v1400_v25  ;;  %1433 = vmatpush1.bf16.msra.mxu1 %v1432_v26 }
 0x164   :  { %1403 = vmatprep.subr.bf16.mxu0 %v1402_v29  ;;  %1435 = vmatprep.subr.bf16.mxu1 %v1434_v30 }
 0x167   :  { %1405 = vmatpush1.bf16.msra.mxu0 %v1404_v37  ;;  %1437 = vmatpush1.bf16.msra.mxu1 %v1436_v38 }
 0x168   :  { %1407 = vmatprep.subr.bf16.mxu0 %v1406_v42  ;;  %1439 = vmatprep.subr.bf16.mxu1 %v1438_v43 }
 0x16b   :  { %1409 = vmatpush1.bf16.msra.mxu0 %v1408_v50  ;;  %1441 = vmatpush1.bf16.msra.mxu1 %v1440_v51 }
 0x16c   :  { %1411 = vmatprep.subr.bf16.mxu0 %v1410_v54  ;;  %1443 = vmatprep.subr.bf16.mxu1 %v1442_v55 }
 0x16f   :  { %1413 = vmatpush1.bf16.msra.mxu0 %v1412_v0  ;;  %1445 = vmatpush1.bf16.msra.mxu1 %v1444_v1 }
 0x170   :  { %1415 = vmatprep.subr.bf16.mxu0 %v1414_v3  ;;  %1447 = vmatprep.subr.bf16.mxu1 %v1446_v4 }
 0x173   :  { %1417 = vmatpush1.bf16.msra.mxu0 %v1416_v8  ;;  %1449 = vmatpush1.bf16.msra.mxu1 %v1448_v9 }
 0x176   :  { %887 = vmatmul.mubr.f32.vlgmr.msra.gmra.mrb[18].mxu0 %v1628_v41  ;;  %970 = vmatmul.mubr.f32.vlgmr.msra.gmra.mrb[18].mxu1 %v1628_v41 }
 0x177   :  { %892 = vmatprep.mubr.f32.mxu0 %v1560_v62  ;;  %975 = vmatprep.mubr.f32.mxu1 %v1560_v62 }
 0x17a   :  { %893 = vmatmul.mubr.f32.gmra.mrb[20].mxu0 %v1632_v63  ;;  %976 = vmatmul.mubr.f32.gmra.mrb[20].mxu1 %v1632_v63 }
 0x17b   :  { %898 = vmatprep.mubr.f32.mxu0 %v1560_v62  ;;  %981 = vmatprep.mubr.f32.mxu1 %v1560_v62 }
 0x17e   :  { %899 = vmatmul.mubr.f32.gmra.mrb[22].mxu0 %v1639_v16  ;;  %982 = vmatmul.mubr.f32.gmra.mrb[22].mxu1 %v1639_v16 }
 0x229   :  { %v722_v10 = vpop.f32.mrb[12].mxu0  ;;  %v805_v11 = vpop.f32.mrb[12].mxu1 }
 0x22a   :  { %988 = vst [vmem:[#allocation8] sm:$0xff] %v722_v10  ;;  %990 = vst [vmem:[#allocation8 + $0x10] sm:$0xff] %v805_v11  ;;  %v724_v41 = vpop.f32.mrb[13].mxu0  ;;  %v807_v12 = vpop.f32.mrb[13].mxu1 }
 0x22b   :  { %989 = vst [vmem:[#allocation8 + $0x8] sm:$0xff] %v724_v41  ;;  %991 = vst [vmem:[#allocation8 + $0x18] sm:$0xff] %v807_v12 }
 0x22d   :  { %v728_v13 = vpop.f32.mrb[14].mxu0  ;;  %v811_v14 = vpop.f32.mrb[14].mxu1 }
 0x22e   :  { %996 = vst [vmem:[#allocation8 + $0x40] sm:$0xff] %v728_v13  ;;  %998 = vst [vmem:[#allocation8 + $0x50] sm:$0xff] %v811_v14  ;;  %v730_v63 = vpop.f32.mrb[15].mxu0  ;;  %v813_v15 = vpop.f32.mrb[15].mxu1 }
 0x22f   :  { %997 = vst [vmem:[#allocation8 + $0x48] sm:$0xff] %v730_v63  ;;  %999 = vst [vmem:[#allocation8 + $0x58] sm:$0xff] %v813_v15 }
 0x231   :  { %v734_v62 = vpop.f32.mrb[16].mxu0  ;;  %v817_v17 = vpop.f32.mrb[16].mxu1 }
 0x232   :  { %1004 = vst [vmem:[#allocation8 + $0x80] sm:$0xff] %v734_v62  ;;  %1006 = vst [vmem:[#allocation8 + $0x90] sm:$0xff] %v817_v17  ;;  %v736_v16 = vpop.f32.mrb[17].mxu0  ;;  %v819_v18 = vpop.f32.mrb[17].mxu1 }
 0x233   :  { %1005 = vst [vmem:[#allocation8 + $0x88] sm:$0xff] %v736_v16  ;;  %1007 = vst [vmem:[#allocation8 + $0x98] sm:$0xff] %v819_v18 }
 0x249   :  { %v888_v20 = vpop.f32.mrb[18].mxu0  ;;  %v971_v19 = vpop.f32.mrb[18].mxu1 }
 0x24a   :  { %992 = vst [vmem:[#allocation8 + $0x20] sm:$0xff] %v888_v20  ;;  %994 = vst [vmem:[#allocation8 + $0x30] sm:$0xff] %v971_v19  ;;  %v890_v21 = vpop.f32.mrb[19].mxu0  ;;  %v973_v22 = vpop.f32.mrb[19].mxu1 }
 0x24b   :  { %993 = vst [vmem:[#allocation8 + $0x28] sm:$0xff] %v890_v21  ;;  %995 = vst [vmem:[#allocation8 + $0x38] sm:$0xff] %v973_v22 }
 0x24d   :  { %v894_v23 = vpop.f32.mrb[20].mxu0  ;;  %v977_v24 = vpop.f32.mrb[20].mxu1 }
 0x24e   :  { %1000 = vst [vmem:[#allocation8 + $0x60] sm:$0xff] %v894_v23  ;;  %1002 = vst [vmem:[#allocation8 + $0x70] sm:$0xff] %v977_v24  ;;  %v896_v25 = vpop.f32.mrb[21].mxu0  ;;  %v979_v26 = vpop.f32.mrb[21].mxu1 }
 0x24f   :  { %1001 = vst [vmem:[#allocation8 + $0x68] sm:$0xff] %v896_v25  ;;  %1003 = vst [vmem:[#allocation8 + $0x78] sm:$0xff] %v979_v26 }
 0x251   :  { %v900_v27 = vpop.f32.mrb[22].mxu0  ;;  %v983_v28 = vpop.f32.mrb[22].mxu1 }
 0x252   :  { %1008 = vst [vmem:[#allocation8 + $0xa0] sm:$0xff] %v900_v27  ;;  %1010 = vst [vmem:[#allocation8 + $0xb0] sm:$0xff] %v983_v28  ;;  %v902_v29 = vpop.f32.mrb[23].mxu0  ;;  %v985_v30 = vpop.f32.mrb[23].mxu1 }
 0x253   :  { %1009 = vst [vmem:[#allocation8 + $0xa8] sm:$0xff] %v902_v29  ;;  %1011 = vst [vmem:[#allocation8 + $0xb8] sm:$0xff] %v985_v30 }
 0x254   :  { %1536 = shalt.err (!%p1533_p0)
}
 0x255   :  { %s1537_s27 = scalar_lea.hbm %s1675_s3, 3072 }
 0x256   :  { %p1538_p1 = scmp.ne.s32.totalorder %s1675_s3, %s1537_s27  ;;  %p1541_p2 = scmp.lt.u32.totalorder %s1537_s27, %s1675_s3 }
 0x258   :  { %p1543_p3 = pnand %p1541_p2, %p1538_p1 }
 0x25a   :  { %1546 = shalt.err (!%p1543_p3)
}
 0x25b   :  { %1023 = dma.vmem_to_hbm [thread:$0]  %s1018_s23, 3072, %s1675_s3, [#allocation4], %s1557_s1, %s1557_s1, %s1558_s9  }
 0x25c   :  { %1551 = dma.done.wait [#allocation4], 3072  }
 0x25d   :  { %1552 = vsyncadd [#allocation4], 4294964224 }
 0x25e   :  { %1027 = vsyncpa [#allocation3], 1 }
 0x25f   :  { %1028 = vsyncpa [#allocation6], 1 }
 0x260   :  { %1029 = vsyncpa [#allocation4], 1 }

</bundles_post_ra>
